<compile_context>
chip_gen: v7x
topology: tpu7x:2x2x1
jax: 0.10.0
libtpu: 0.0.40
codegen_flags: <defaults>
</compile_context>

<pallas_src>
import functools

import jax
import jax.numpy as jnp
from jax.experimental import pallas as pl
from jax.experimental.pallas import tpu as pltpu

DMAX = 128  # all layer widths (32 / 64 / 128 / 16) pad to a single 128-lane tile


# ----------------------------- Fused Pallas kernel -----------------------------

def _make_fused_mlp_kernel(num_layers, in_dim):
    """kernel(x_ref, w_ref, b_ref, o_ref):
         o = l2norm(relu(...relu(x @ W1 + b1)...)) with all layers fused."""

    def kernel(x_ref, w_ref, b_ref, o_ref):
        x = x_ref[...].astype(jnp.float32)          # [B, in_dim] f32

        # Python loop is unrolled at trace time: each layer's bias broadcast and
        # weight slice is emitted exactly once (no re-broadcast in a runtime loop).
        for i in range(num_layers):
            if i == 0:
                # First layer: use only the real K=in_dim rows of the stacked,
                # padded weight so x needs no lane padding (static sublane slice).
                w = w_ref[0, 0:in_dim, :]            # [in_dim, 128] bf16
            else:
                w = w_ref[i]                         # [128, 128] bf16
            b = b_ref[i]                             # [1, 128] f32 -> broadcast over batch
            y = jnp.dot(x.astype(jnp.bfloat16), w,
                        preferred_element_type=jnp.float32)   # f32 accumulation on MXU
            x = jnp.maximum(y + b, 0.0)              # ReLU after every Linear (matches ref)

        # L2 normalize along features. Padded columns are exactly 0, so the norm over
        # the padded width equals the norm over the true width.
        sq = jnp.sum(x * x, axis=1, keepdims=True)
        inv = jax.lax.rsqrt(jnp.maximum(sq, 1e-24))  # == 1 / max(||x||, 1e-12)
        o_ref[...] = (x * inv).astype(o_ref.dtype)   # lane-dense [B, 128] store

    return kernel


# ------------------------------ Param preparation (one-time) -------------------

def init_simplenet_params(key, linear_widths):
    """Xavier-normal weights (gain=1), bias filled with 0.01; deterministic.
    Weights stored as [in, out] (transpose of PyTorch's [out, in]) for x @ W."""
    params = []
    for i in range(1, len(linear_widths)):
        inp_dim = linear_widths[i - 1]
        out_dim = linear_widths[i]
        key, wkey = jax.random.split(key)
        std = (2.0 / (inp_dim + out_dim)) ** 0.5     # xavier_normal_, gain=1
        w = std * jax.random.normal(wkey, (inp_dim, out_dim), dtype=jnp.float32)
        b = jnp.full((1, out_dim), 0.01, dtype=jnp.float32)
        params.append((w, b))
    return params


def prepare_params(params, dmax=DMAX):
    """One-time: zero-pad every layer to [dmax, dmax]/[1, dmax], stack along a new
    leading layer axis, and cast weights to bf16. Runs once at init, never per call."""
    num_layers = len(params)
    for (w, _) in params:
        assert w.shape[0] <= dmax and w.shape[1] <= dmax
    w_stack = jnp.zeros((num_layers, dmax, dmax), dtype=jnp.bfloat16)
    b_stack = jnp.zeros((num_layers, 1, dmax), dtype=jnp.float32)
    for i, (w, b) in enumerate(params):
        ip, op = w.shape
        w_stack = w_stack.at[i, :ip, :op].set(w.astype(jnp.bfloat16))
        b_stack = b_stack.at[i, :, :op].set(b)
    return jax.device_put(w_stack), jax.device_put(b_stack)


# ------------------------------ Forward wrapper ---------------------------------

@functools.partial(jax.jit, static_argnames=("out_dim",))
def simplenet_forward(x, w_stack, b_stack, *, out_dim):
    """x: [B, in_dim] f32; w_stack: [L, 128, 128] bf16; b_stack: [L, 1, 128] f32."""
    B, in_dim = x.shape
    num_layers, dmax, _ = w_stack.shape

    kernel = _make_fused_mlp_kernel(num_layers, in_dim)
    vmem = pl.BlockSpec(memory_space=pltpu.MemorySpace.VMEM)

    y_p = pl.pallas_call(
        kernel,
        out_shape=jax.ShapeDtypeStruct((B, dmax), x.dtype),
        in_specs=[vmem, vmem, vmem],     # whole-array blocks, fully VMEM-resident
        out_specs=vmem,
    )(x, w_stack, b_stack)

    # Single tiny slice back to the true output width (outside the kernel).
    return y_p[:, :out_dim]


# ------------------------------ Main ---------------------------------------

if __name__ == "__main__":
    batch = 8
    linear_widths = [32, 64, 128, 16]    # input_dim=32, output_dim=16
    input_dim = linear_widths[0]
    output_dim = linear_widths[-1]

    key = jax.random.PRNGKey(0)
    key, xkey, pkey = jax.random.split(key, 3)

    x = jax.random.normal(xkey, (batch, input_dim), dtype=jnp.float32)
    params = init_simplenet_params(pkey, linear_widths)

    # One-time padding / stacking / bf16 cast (off the per-call critical path).
    w_stack, b_stack = prepare_params(params)

    out = simplenet_forward(x, w_stack, b_stack, out_dim=output_dim)
    out = jax.block_until_ready(out)

    assert out.shape == (batch, output_dim)

    # Rows are unit-norm (or zero if every final activation relu'd to 0).
    norms = jnp.linalg.norm(out, axis=1)
    assert bool(jnp.all((jnp.abs(norms - 1.0) < 1e-4) | (norms < 1e-6)))

    # Cross-check against a pure-JAX reference doing the same math (bf16 matmul
    # inputs, f32 accumulation, f32 bias/ReLU/normalize) -- validates the kernel.
    ref = x
    for (w, b) in params:
        y = jnp.dot(ref.astype(jnp.bfloat16), w.astype(jnp.bfloat16),
                    preferred_element_type=jnp.float32)
        ref = jnp.maximum(y + b, 0.0)
    ref = ref / jnp.maximum(jnp.linalg.norm(ref, axis=1, keepdims=True), 1e-12)
    assert bool(jnp.allclose(out, ref, atol=1e-4, rtol=1e-4))

    print("KERNEL_OK")
</pallas_src>

<mosaic_0001>
module attributes {stable_mosaic.version = 11 : i64} {
  func.func @kernel(%arg0: memref<8x32xf32, #tpu.memory_space<vmem>>, %arg1: memref<3x128x128xbf16, #tpu.memory_space<vmem>>, %arg2: memref<3x1x128xf32, #tpu.memory_space<vmem>>, %arg3: memref<8x128xf32, #tpu.memory_space<vmem>>) attributes {dimension_semantics = [], scalar_prefetch = 0 : i64, scratch_operands = 0 : i64, tpu.core_type = #tpu.core_type<tc>} {
    %c0 = arith.constant 0 : index
    %c0_0 = arith.constant 0 : index
    %0 = vector.load %arg0[%c0, %c0_0] : memref<8x32xf32, #tpu.memory_space<vmem>>, vector<8x32xf32>
    %c0_1 = arith.constant 0 : index
    %c0_2 = arith.constant 0 : index
    %c0_3 = arith.constant 0 : index
    %1 = vector.load %arg1[%c0_1, %c0_2, %c0_3] : memref<3x128x128xbf16, #tpu.memory_space<vmem>>, vector<1x32x128xbf16>
    %2 = vector.shape_cast %1 : vector<1x32x128xbf16> to vector<32x128xbf16>
    %c0_4 = arith.constant 0 : index
    %c0_5 = arith.constant 0 : index
    %c0_6 = arith.constant 0 : index
    %3 = vector.load %arg2[%c0_4, %c0_5, %c0_6] : memref<3x1x128xf32, #tpu.memory_space<vmem>>, vector<1x1x128xf32>
    %4 = vector.shape_cast %3 : vector<1x1x128xf32> to vector<1x128xf32>
    %5 = arith.truncf %0 : vector<8x32xf32> to vector<8x32xbf16>
    %cst = arith.constant dense<0.000000e+00> : vector<8x128xf32>
    %6 = tpu.matmul %5, %2, %cst {dimension_numbers = #tpu.dot_dimension_numbers<[1], [0], [0], [1], [0, 0, 1, 1], [], []>} : vector<8x32xbf16>, vector<32x128xbf16>, vector<8x128xf32> -> vector<8x128xf32>
    %7 = vector.broadcast %4 : vector<1x128xf32> to vector<8x128xf32>
    %8 = arith.addf %6, %7 : vector<8x128xf32>
    %cst_7 = arith.constant 0.000000e+00 : f32
    %9 = vector.broadcast %cst_7 : f32 to vector<8x128xf32>
    %10 = arith.maximumf %8, %9 : vector<8x128xf32>
    %c1 = arith.constant 1 : index
    %c0_8 = arith.constant 0 : index
    %c0_9 = arith.constant 0 : index
    %11 = vector.load %arg1[%c1, %c0_8, %c0_9] : memref<3x128x128xbf16, #tpu.memory_space<vmem>>, vector<1x128x128xbf16>
    %12 = vector.shape_cast %11 : vector<1x128x128xbf16> to vector<128x128xbf16>
    %c1_10 = arith.constant 1 : index
    %c0_11 = arith.constant 0 : index
    %c0_12 = arith.constant 0 : index
    %13 = vector.load %arg2[%c1_10, %c0_11, %c0_12] : memref<3x1x128xf32, #tpu.memory_space<vmem>>, vector<1x1x128xf32>
    %14 = vector.shape_cast %13 : vector<1x1x128xf32> to vector<1x128xf32>
    %15 = arith.truncf %10 : vector<8x128xf32> to vector<8x128xbf16>
    %cst_13 = arith.constant dense<0.000000e+00> : vector<8x128xf32>
    %16 = tpu.matmul %15, %12, %cst_13 {dimension_numbers = #tpu.dot_dimension_numbers<[1], [0], [0], [1], [0, 0, 1, 1], [], []>} : vector<8x128xbf16>, vector<128x128xbf16>, vector<8x128xf32> -> vector<8x128xf32>
    %17 = vector.broadcast %14 : vector<1x128xf32> to vector<8x128xf32>
    %18 = arith.addf %16, %17 : vector<8x128xf32>
    %cst_14 = arith.constant 0.000000e+00 : f32
    %19 = vector.broadcast %cst_14 : f32 to vector<8x128xf32>
    %20 = arith.maximumf %18, %19 : vector<8x128xf32>
    %c2 = arith.constant 2 : index
    %c0_15 = arith.constant 0 : index
    %c0_16 = arith.constant 0 : index
    %21 = vector.load %arg1[%c2, %c0_15, %c0_16] : memref<3x128x128xbf16, #tpu.memory_space<vmem>>, vector<1x128x128xbf16>
    %22 = vector.shape_cast %21 : vector<1x128x128xbf16> to vector<128x128xbf16>
    %c2_17 = arith.constant 2 : index
    %c0_18 = arith.constant 0 : index
    %c0_19 = arith.constant 0 : index
    %23 = vector.load %arg2[%c2_17, %c0_18, %c0_19] : memref<3x1x128xf32, #tpu.memory_space<vmem>>, vector<1x1x128xf32>
    %24 = vector.shape_cast %23 : vector<1x1x128xf32> to vector<1x128xf32>
    %25 = arith.truncf %20 : vector<8x128xf32> to vector<8x128xbf16>
    %cst_20 = arith.constant dense<0.000000e+00> : vector<8x128xf32>
    %26 = tpu.matmul %25, %22, %cst_20 {dimension_numbers = #tpu.dot_dimension_numbers<[1], [0], [0], [1], [0, 0, 1, 1], [], []>} : vector<8x128xbf16>, vector<128x128xbf16>, vector<8x128xf32> -> vector<8x128xf32>
    %27 = vector.broadcast %24 : vector<1x128xf32> to vector<8x128xf32>
    %28 = arith.addf %26, %27 : vector<8x128xf32>
    %cst_21 = arith.constant 0.000000e+00 : f32
    %29 = vector.broadcast %cst_21 : f32 to vector<8x128xf32>
    %30 = arith.maximumf %28, %29 : vector<8x128xf32>
    %31 = arith.mulf %30, %30 : vector<8x128xf32>
    %cst_22 = arith.constant dense<0.000000e+00> : vector<8xf32>
    %32 = vector.multi_reduction <add>, %31, %cst_22 [1] : vector<8x128xf32> to vector<8xf32>
    %33 = vector.shape_cast %32 : vector<8xf32> to vector<8x1xf32>
    %cst_23 = arith.constant 1.000000e-24 : f32
    %34 = vector.broadcast %cst_23 : f32 to vector<8x1xf32>
    %35 = arith.maximumf %33, %34 : vector<8x1xf32>
    %36 = math.rsqrt %35 : vector<8x1xf32>
    %37 = vector.broadcast %36 : vector<8x1xf32> to vector<8x128xf32>
    %38 = arith.mulf %30, %37 : vector<8x128xf32>
    %c0_24 = arith.constant 0 : index
    %c0_25 = arith.constant 0 : index
    %39 = vector.load %arg3[%c0_24, %c0_25] : memref<8x128xf32, #tpu.memory_space<vmem>>, vector<8x128xf32>
    tpu.vector_store %arg3[%c0_24, %c0_25], %38 {strides = array<i32>} : memref<8x128xf32, #tpu.memory_space<vmem>>, vector<8x128xf32>,
    return
  }
}

</mosaic_0001>

<bundles_post_ra>
// kernel: simplenet_forward.1
= control target key start
LH: loop header
LB: loop body
LE: loop exit
PB: predicated region body
PF: predicated region fallthrough
CT: control target
= control target key end

     0   :  { %8 = vsyncpa [#allocation3], 0  ;;  %s660_s0 = inlined_call_operand.hbm [shape: f32[8,32], index: 0, kind: input, shape index: {}]   ;;  %s661_s1 = inlined_call_operand.hbm [shape: bf16[3,128,128], index: 1, kind: input, shape index: {}]   ;;  %s662_s2 = inlined_call_operand.vmem [shape: f32[3,1,128], index: 2, kind: input, shape index: {}]   ;;  %s663_s3 = inlined_call_operand.hbm [shape: f32[8,128], index: 3, kind: output, shape index: {}]  }
   0x1   :  { %9 = vsyncpa [#allocation6], 0 }
   0x2   :  { %10 = vsyncpa [#allocation4], 0  ;;  %s557_s12 = smov [#allocation2]   ;;  %s558_s14 = smov [#allocation5]  }
   0x3   :  { %s17_s13 = sshll.u32 %s557_s12, 4  ;;  %s26_s15 = sshll.u32 %s558_s14, 4  ;;  %s18_s13 = int_to_ptr.vmem [resolvable:$true] %s17_s13  ;;  %s584_s15 = int_to_ptr.vmem [resolvable:$true] %s26_s15 }
   0x4   :  { %s485_s18 = scalar_lea.hbm %s660_s0, 128 }
   0x5   :  { %p486_p0 = scmp.ne.s32.totalorder %s660_s0, %s485_s18  ;;  %p489_p1 = scmp.lt.u32.totalorder %s485_s18, %s660_s0 }
   0x7   :  { %p491_p2 = pnand %p489_p1, %p486_p0 }
   0x9   :  { %494 = shalt.err (!%p491_p2)
}
   0xa   :  { %s495_s23 = scalar_lea.vmem %s18_s13, 128  ;;  %p500_p4 = scmp.lt.s32.totalorder %s18_s13, %s18_s13 }
   0xb   :  { %p496_p3 = scmp.ne.s32.totalorder %s18_s13, %s495_s23  ;;  %p501_p5 = scmp.lt.s32.totalorder %s495_s23, %s495_s23 }
   0xd   :  { %p502_p6 = por %p501_p5, %p500_p4 }
   0xf   :  { %p503_p7 = pnand %p502_p6, %p496_p3 }
  0x11   :  { %506 = shalt.err (!%p503_p7)
}
  0x12   :  { %20 = dma.hbm_to_vmem [thread:$0]  %s660_s0, 128, %s18_s13, [#allocation3]  }
  0x13   :  { %s507_s28 = scalar_lea.hbm %s661_s1, 3072 }
  0x14   :  { %p508_p8 = scmp.ne.s32.totalorder %s661_s1, %s507_s28  ;;  %p511_p9 = scmp.lt.u32.totalorder %s507_s28, %s661_s1 }
  0x16   :  { %p513_p10 = pnand %p511_p9, %p508_p8 }
  0x18   :  { %516 = shalt.err (!%p513_p10)
}
  0x19   :  { %s517_s6 = scalar_lea.vmem %s584_s15, 3072  ;;  %p522_p12 = scmp.lt.s32.totalorder %s584_s15, %s584_s15 }
  0x1a   :  { %p518_p11 = scmp.ne.s32.totalorder %s584_s15, %s517_s6  ;;  %p523_p13 = scmp.lt.s32.totalorder %s517_s6, %s517_s6 }
  0x1c   :  { %p524_p0 = por %p523_p13, %p522_p12 }
  0x1e   :  { %p525_p1 = pnand %p524_p0, %p518_p11 }
  0x20   :  { %528 = shalt.err (!%p525_p1)
}
  0x21   :  { %s559_s0 = smov 64   ;;  %s560_s7 = smov 4  }
  0x22   :  { %32 = dma.hbm_to_vmem [thread:$0]  %s661_s1, 3072, %s584_s15, [#allocation6], %s559_s0, %s559_s0, %s560_s7  }
  0x23   :  { %551 = dma.done.wait [#allocation3], 128  }
  0x24   :  { %552 = vsyncadd [#allocation3], 4294967168 }
  0x25   :  { %553 = dma.done.wait [#allocation6], 3072  }
  0x26   :  { %554 = vsyncadd [#allocation6], 4294964224  ;;  %v561_v0 = vmov 0.0   ;;  %vm562_vm0 = vmmov 0   ;;  %v465_v1 = vld [vmem:[#allocation5] sm:$0xff]   ;;  %v466_v2 = vld [vmem:[#allocation5 + $0x8] sm:$0xff]  }
  0x27   :  { %410 = vmatprep.subr.bf16.mxu0 %v561_v0  ;;  %414 = vmatprep.mubr.msk.bf16.mxu0 %vm562_vm0, %v561_v0  ;;  %v42_v3 = vld [vmem:[#allocation2] sm:$0xff]  ;;  %v467_v4 = vld [vmem:[#allocation5 + $0x40] sm:$0xff]   ;;  %v468_v6 = vld [vmem:[#allocation5 + $0x48] sm:$0xff]   ;;  %vm67_vm1 = vcmask 261120   ;;  %s563_s15 = smov [#allocation7]  }
  0x28   :  { %418 = vmatprep.subr.bf16.mxu1 %v561_v0  ;;  %434 = vmatprep.mubr.msk.bf16.mxu1 %vm562_vm0, %v561_v0  ;;  %v48_v5 = vpack.c.bf16 %v42_v3, %v42_v3  ;;  %v469_v7 = vld [vmem:[#allocation5 + $0x50] sm:$0xff]   ;;  %v470_v8 = vld [vmem:[#allocation5 + $0x58] sm:$0xff]   ;;  %v471_v9 = vld [vmem:[#allocation5 + $0x60] sm:$0xff]   ;;  %s355_s16 = sshll.u32 %s563_s15, 4  ;;  %s356_s16 = int_to_ptr.vmem [resolvable:$true] %s355_s16 }
  0x29   :  { %411 = vmatpush3.bf16.msra.mxu0 %v465_v1  ;;  %419 = vmatpush3.bf16.msra.mxu1 %v467_v4  ;;  %v472_v10 = vld [vmem:[#allocation5 + $0x68] sm:$0xff]   ;;  %v473_v11 = vld [vmem:[#allocation5 + $0x70] sm:$0xff]   ;;  %v474_v12 = vld [vmem:[#allocation5 + $0x78] sm:$0xff]   ;;  %s529_s17 = scalar_lea.vmem %s356_s16, 128  ;;  %p534_p3 = scmp.lt.s32.totalorder %s356_s16, %s356_s16 }
  0x2a   :  { %412 = vmatprep.subr.bf16.mxu0 %v561_v0  ;;  %420 = vmatprep.subr.bf16.mxu1 %v561_v0  ;;  %v475_v13 = vld [vmem:[#allocation5 + $0x80] sm:$0xff]   ;;  %v476_v14 = vld [vmem:[#allocation5 + $0x88] sm:$0xff]   ;;  %v477_v15 = vld [vmem:[#allocation5 + $0x90] sm:$0xff]   ;;  %p530_p2 = scmp.ne.s32.totalorder %s356_s16, %s529_s17  ;;  %p535_p4 = scmp.lt.s32.totalorder %s529_s17, %s529_s17 }
  0x2b   :  { %v478_v16 = vld [vmem:[#allocation5 + $0x98] sm:$0xff]   ;;  %v479_v17 = vld [vmem:[#allocation5 + $0xa0] sm:$0xff]   ;;  %v480_v18 = vld [vmem:[#allocation5 + $0xa8] sm:$0xff]  }
  0x2c   :  { %v365_v19 = vld [vmem:[%s662_s2] ss:$0 sm:$0xff]  ;;  %v481_v27 = vld [vmem:[#allocation5 + $0xb0] sm:$0xff]   ;;  %v370_v29 = vld [vmem:[%s662_s2 + $0x1] ss:$0 sm:$0xff]  ;;  %p536_p5 = por %p535_p4, %p534_p3 }
  0x2d   :  { %413 = vmatpush3.bf16.msra.mxu0 %v466_v2  ;;  %421 = vmatpush3.bf16.msra.mxu1 %v468_v6  ;;  %v482_v28 = vld [vmem:[#allocation5 + $0xb8] sm:$0xff]  }
  0x2e   :  { %438 = vmatprep.subr.bf16.mxu0 %v561_v0  ;;  %422 = vmatprep.subr.bf16.mxu1 %v561_v0  ;;  %v380_v37 = vld [vmem:[%s662_s2 + $0x2] ss:$0 sm:$0xff]  ;;  %p537_p6 = pnand %p536_p5, %p530_p2 }
  0x30   :  { %415 = vmatmul.mubr.msk.bf16.vlgmr.msra.gmra.mrb[0].mxu0 %vm67_vm1, %v48_v5 }
  0x31   :  { %454 = vmatprep.mubr.msk.bf16.mxu0 %vm562_vm0, %v561_v0  ;;  %423 = vmatpush3.bf16.msra.mxu1 %v469_v7 }
  0x32   :  { %424 = vmatprep.subr.bf16.mxu1 %v561_v0  ;;  %439 = vmatpush3.bf16.msra.mxu0 %v475_v13 }
  0x33   :  { %440 = vmatprep.subr.bf16.mxu0 %v561_v0 }
  0x35   :  { %425 = vmatpush3.bf16.msra.mxu1 %v470_v8 }
  0x36   :  { %426 = vmatprep.subr.bf16.mxu1 %v561_v0  ;;  %441 = vmatpush3.bf16.msra.mxu0 %v476_v14 }
  0x37   :  { %442 = vmatprep.subr.bf16.mxu0 %v561_v0 }
  0x39   :  { %427 = vmatpush3.bf16.msra.mxu1 %v471_v9 }
  0x3a   :  { %428 = vmatprep.subr.bf16.mxu1 %v561_v0  ;;  %443 = vmatpush3.bf16.msra.mxu0 %v477_v15 }
  0x3b   :  { %444 = vmatprep.subr.bf16.mxu0 %v561_v0 }
  0x3d   :  { %429 = vmatpush3.bf16.msra.mxu1 %v472_v10 }
  0x3e   :  { %430 = vmatprep.subr.bf16.mxu1 %v561_v0  ;;  %445 = vmatpush3.bf16.msra.mxu0 %v478_v16 }
  0x3f   :  { %446 = vmatprep.subr.bf16.mxu0 %v561_v0 }
  0x41   :  { %431 = vmatpush3.bf16.msra.mxu1 %v473_v11 }
  0x42   :  { %432 = vmatprep.subr.bf16.mxu1 %v561_v0  ;;  %447 = vmatpush3.bf16.msra.mxu0 %v479_v17 }
  0x43   :  { %448 = vmatprep.subr.bf16.mxu0 %v561_v0 }
  0x45   :  { %433 = vmatpush3.bf16.msra.mxu1 %v474_v12 }
  0x46   :  { %449 = vmatpush3.bf16.msra.mxu0 %v480_v18 }
  0x47   :  { %450 = vmatprep.subr.bf16.mxu0 %v561_v0 }
  0x4a   :  { %451 = vmatpush3.bf16.msra.mxu0 %v481_v27 }
  0x4b   :  { %452 = vmatprep.subr.bf16.mxu0 %v561_v0 }
  0x4e   :  { %453 = vmatpush3.bf16.msra.mxu0 %v482_v28 }
 0x103   :  { %v105_v20 = vpop.f32.mrb[0].mxu0 }
 0x104   :  { %v106_v21 = vadd.f32 %v365_v19, %v105_v20  ;;  %v416_v22 = vpop.f32.mrb[1].mxu0 }
 0x105   :  { %v108_v23 = vpop.f32.mrb[2].mxu0 }
 0x106   :  { %v111_v24 = vmax.f32 %v106_v21, 0.0  ;;  %v417_v25 = vpop.f32.mrb[3].mxu0 }
 0x108   :  { %v131_v26 = vpack.c.bf16 %v111_v24, %v111_v24 }
 0x10a   :  { %435 = vmatmul.mubr.bf16.vlgmr.msra.gmra.mrb[0].mxu1 %v131_v26 }
 0x1dd   :  { %v220_v30 = vpop.f32.mrb[0].mxu1 }
 0x1de   :  { %v221_v31 = vadd.f32 %v370_v29, %v220_v30  ;;  %v436_v32 = vpop.f32.mrb[1].mxu1 }
 0x1df   :  { %v223_v33 = vpop.f32.mrb[2].mxu1 }
 0x1e0   :  { %v226_v34 = vmax.f32 %v221_v31, 0.0  ;;  %v437_v35 = vpop.f32.mrb[3].mxu1 }
 0x1e2   :  { %v246_v36 = vpack.c.bf16 %v226_v34, %v226_v34 }
 0x1e4   :  { %455 = vmatmul.mubr.bf16.vlgmr.msra.gmra.mrb[4].mxu0 %v246_v36 }
 0x2b7   :  { %v335_v38 = vpop.f32.mrb[4].mxu0 }
 0x2b8   :  { %v336_v39 = vadd.f32 %v380_v37, %v335_v38  ;;  %v456_v40 = vpop.f32.mrb[5].mxu0 }
 0x2b9   :  { %v338_v41 = vpop.f32.mrb[6].mxu0 }
 0x2ba   :  { %v341_v42 = vmax.f32 %v336_v39, 0.0  ;;  %v457_v43 = vpop.f32.mrb[7].mxu0 }
 0x2bc   :  { %v342_v44 = vmul.f32 %v341_v42, %v341_v42 }
 0x2be   :  { %343 = vadd.xlane.f32.xlu0 %v342_v44 }
 0x34b   :  { %v344_v45 = vpop.xlane.xlu0 %343 }
 0x34c   :  { %v345_v46 = vmax.f32 %v344_v45, 1e-24 }
 0x34e   :  { %483 = vrsqrt.f32 %v345_v46 }
 0x358   :  { %v484_v47 = vpop.eup %483 }
 0x359   :  { %v347_v48 = vmul.f32 %v484_v47, %v341_v42 }
 0x35b   :  { %348 = vst [vmem:[#allocation7] sm:$0xff] %v347_v48 }
 0x35c   :  { %540 = shalt.err (!%p537_p6)
}
 0x35d   :  { %s541_s19 = scalar_lea.hbm %s663_s3, 128 }
 0x35e   :  { %p542_p7 = scmp.ne.s32.totalorder %s663_s3, %s541_s19  ;;  %p545_p8 = scmp.lt.u32.totalorder %s541_s19, %s663_s3 }
 0x360   :  { %p547_p9 = pnand %p545_p8, %p542_p7 }
 0x362   :  { %550 = shalt.err (!%p547_p9)
}
 0x363   :  { %358 = dma.vmem_to_hbm [thread:$0]  %s356_s16, 128, %s663_s3, [#allocation4]  }
 0x364   :  { %555 = dma.done.wait [#allocation4], 128  }
 0x365   :  { %556 = vsyncadd [#allocation4], 4294967168 }
 0x366   :  { %362 = vsyncpa [#allocation3], 1 }
 0x367   :  { %363 = vsyncpa [#allocation6], 1 }
 0x368   :  { %364 = vsyncpa [#allocation4], 1 }

</bundles_post_ra>
